<compile_context>
chip_gen: v7x
topology: tpu7x:2x2x1
jax: 0.10.0
libtpu: 0.0.40
codegen_flags: <defaults>
</compile_context>

<pallas_src>
import functools

import jax
import jax.numpy as jnp
from jax.experimental import pallas as pl
from jax.experimental.pallas import tpu as pltpu

N = 128          # problem size (number of unknowns / rows)
DEGREE = 7       # Jacobi degree -> feature_dim = DEGREE + 1 = 8
FEAT = DEGREE + 1
EPS = 1e-12      # F.normalize default eps

# Contract v's dim 1 with M's dim 1:  out[0, i] = sum_j v[0, j] * M[i, j] = (M @ v)^T
_NT_DIMS = (((1,), (1,)), ((), ()))


def jacobi_kernel(m_ref, b_ref, d_ref, out_ref, *, degree):
    # m_ref: (N, N) = M (un-transposed); b_ref / d_ref: (1, N); out_ref: (FEAT, N).
    m = m_ref[...]                    # (N, N) f32
    b = b_ref[...]                    # (1, N)
    d = d_ref[...]                    # (1, N)
    n = m.shape[-1]

    inv_d = 1.0 / d                   # exact division, matches torch semantics
    bias = b * inv_d                  # (1, N)

    # diag(M) extracted in-kernel (VPU select + XLU sublane reduce; off the MXU path).
    row = jax.lax.broadcasted_iota(jnp.int32, (n, n), 0)
    col = jax.lax.broadcasted_iota(jnp.int32, (n, n), 1)
    diag = jnp.sum(jnp.where(row == col, m, 0.0), axis=0, keepdims=True)  # (1, N)
    corr = diag * inv_d               # cancels the would-be diagonal of H

    # Jacobi recurrence in row-vector form, contracting against M's last dim (trans-B):
    #   v_k^T = bias^T + inv_d * (M @ v_{k-1})^T - corr * v_{k-1}^T
    feats = [bias]
    v = bias
    for _ in range(degree):           # static, short unrolled loop (dependent chain)
        mv = jax.lax.dot_general(v, m, _NT_DIMS,
                                 preferred_element_type=jnp.float32)   # (1, N)
        v = bias + inv_d * mv - corr * v
        feats.append(v)

    f = jnp.concatenate(feats, axis=0)                      # (FEAT, N) = (8, 128)

    # F.normalize(p=inf, dim=0) of the (N, FEAT) features == per-row (lane-axis)
    # max-abs reduce in this transposed layout.
    norm = jnp.maximum(jnp.max(jnp.abs(f), axis=-1, keepdims=True), EPS)  # (FEAT, 1)
    out_ref[...] = f / norm                                  # single unmasked store


@functools.partial(jax.jit, static_argnames=("degree",))
def jacobi_preprocessor(m, b, d, degree=DEGREE):
    """Batched Jacobi preprocessor.

    m: (B, N, N) or (N, N) dense system matrices; b, d: (B, N) or (N,).
    Returns (B, N, degree+1) (or (N, degree+1) for unbatched inputs), matching the
    torch per-system output layout.
    """
    squeeze = m.ndim == 2
    if squeeze:
        m, b, d = m[None], b[None], d[None]
    bsz, n, _ = m.shape
    feat = degree + 1

    m32 = m.astype(jnp.float32)                      # no transpose, no diagonal extraction
    b_row = b.reshape(bsz, 1, n).astype(jnp.float32)
    d_row = d.reshape(bsz, 1, n).astype(jnp.float32)

    feats_t = pl.pallas_call(
        functools.partial(jacobi_kernel, degree=degree),
        grid=(bsz,),
        out_shape=jax.ShapeDtypeStruct((bsz, feat, n), jnp.float32),
        in_specs=[
            pl.BlockSpec((None, n, n), lambda i: (i, 0, 0)),   # M, batch dim squeezed
            pl.BlockSpec((None, 1, n), lambda i: (i, 0, 0)),   # b row
            pl.BlockSpec((None, 1, n), lambda i: (i, 0, 0)),   # d row
        ],
        out_specs=pl.BlockSpec((None, feat, n), lambda i: (i, 0, 0)),
        compiler_params=pltpu.CompilerParams(
            dimension_semantics=("parallel",)),
    )(m32, b_row, d_row)

    out = jnp.swapaxes(feats_t, -1, -2)              # (B, N, FEAT), torch layout
    return out[0] if squeeze else out


def jacobi_reference(m_dense, b, d, degree=DEGREE):
    n = b.shape[0]
    h = m_dense / d[:, None]
    idx = jnp.arange(n)
    h = h.at[idx, idx].set(0.0)
    bias = (b / d)[:, None]
    feats = [bias]
    v = bias
    for _ in range(degree):
        v = bias + h @ v
        feats.append(v)
    f = jnp.concatenate(feats, axis=-1)
    norm = jnp.maximum(jnp.max(jnp.abs(f), axis=0, keepdims=True), EPS)
    return f / norm


if __name__ == "__main__":
    key = jax.random.PRNGKey(0)
    B = 4
    keys = jax.random.split(key, B)

    ms, bs = [], []
    for kb in keys:
        k1, k2, k3 = jax.random.split(kb, 3)
        # Synthetic sparse-ish, diagonally dominant system matrix M (dense storage).
        mi = jax.random.normal(k1, (N, N), dtype=jnp.float32)
        mask = jax.random.uniform(k2, (N, N)) < 0.1
        mi = jnp.where(mask, mi, 0.0) + jnp.eye(N, dtype=jnp.float32) * (0.5 * N)
        ms.append(mi)
        bs.append(jax.random.normal(k3, (N,), dtype=jnp.float32))

    m_batch = jnp.stack(ms)                              # (B, N, N)
    b_batch = jnp.stack(bs)                              # (B, N)
    d_batch = jnp.diagonal(m_batch, axis1=1, axis2=2)    # Jacobi convention: d = diag(M)

    out = jacobi_preprocessor(m_batch, b_batch, d_batch, degree=DEGREE)
    out = jax.block_until_ready(out)
    assert out.shape == (B, N, FEAT)

    ref = jax.vmap(lambda mm, bb, dd: jacobi_reference(mm, bb, dd, DEGREE))(
        m_batch, b_batch, d_batch)
    assert jnp.allclose(out, ref, atol=1e-4, rtol=1e-4), "mismatch vs reference"

    # TODO(synk): the torch version consumes a true sparse COO tensor (indices/values);
    # the matrix is densified here since Pallas TPU has no native COO SpMM path.
    print("KERNEL_OK")
</pallas_src>

<mosaic_0001>
module attributes {stable_mosaic.version = 11 : i64} {
  func.func @jacobi_kernel(%arg0: i32, %arg1: memref<1x128x128xf32, #tpu.memory_space<vmem>>, %arg2: memref<1x1x128xf32, #tpu.memory_space<vmem>>, %arg3: memref<1x1x128xf32, #tpu.memory_space<vmem>>, %arg4: memref<1x8x128xf32, #tpu.memory_space<vmem>>) attributes {dimension_semantics = [#tpu.dimension_semantics<parallel>], iteration_bounds = array<i64: 4>, scalar_prefetch = 0 : i64, scratch_operands = 0 : i64, tpu.core_type = #tpu.core_type<tc>, window_params = [{transform_indices = @transform_0, window_bounds = array<i64: 1, 128, 128>}, {transform_indices = @transform_1, window_bounds = array<i64: 1, 1, 128>}, {transform_indices = @transform_2, window_bounds = array<i64: 1, 1, 128>}, {transform_indices = @transform_3, window_bounds = array<i64: 1, 8, 128>}]} {
    %c0 = arith.constant 0 : index
    %c0_0 = arith.constant 0 : index
    %c0_1 = arith.constant 0 : index
    %0 = vector.load %arg1[%c0, %c0_0, %c0_1] : memref<1x128x128xf32, #tpu.memory_space<vmem>>, vector<1x128x128xf32>
    %1 = vector.shape_cast %0 : vector<1x128x128xf32> to vector<128x128xf32>
    %c0_2 = arith.constant 0 : index
    %c0_3 = arith.constant 0 : index
    %c0_4 = arith.constant 0 : index
    %2 = vector.load %arg2[%c0_2, %c0_3, %c0_4] : memref<1x1x128xf32, #tpu.memory_space<vmem>>, vector<1x1x128xf32>
    %3 = vector.shape_cast %2 : vector<1x1x128xf32> to vector<1x128xf32>
    %c0_5 = arith.constant 0 : index
    %c0_6 = arith.constant 0 : index
    %c0_7 = arith.constant 0 : index
    %4 = vector.load %arg3[%c0_5, %c0_6, %c0_7] : memref<1x1x128xf32, #tpu.memory_space<vmem>>, vector<1x1x128xf32>
    %5 = vector.shape_cast %4 : vector<1x1x128xf32> to vector<1x128xf32>
    %cst = arith.constant 1.000000e+00 : f32
    %6 = vector.broadcast %cst : f32 to vector<1x128xf32>
    %7 = arith.divf %6, %5 : vector<1x128xf32>
    %8 = arith.mulf %3, %7 : vector<1x128xf32>
    %9 = tpu.iota {dimensions = array<i32: 0>} : vector<128x128xi32>
    %10 = tpu.iota {dimensions = array<i32: 1>} : vector<128x128xi32>
    %11 = arith.cmpi eq, %9, %10 : vector<128x128xi32>
    %cst_8 = arith.constant 0.000000e+00 : f32
    %12 = vector.broadcast %cst_8 : f32 to vector<128x128xf32>
    %13 = arith.select %11, %1, %12 : vector<128x128xi1>, vector<128x128xf32>
    %cst_9 = arith.constant dense<0.000000e+00> : vector<128xf32>
    %14 = vector.multi_reduction <add>, %13, %cst_9 [0] : vector<128x128xf32> to vector<128xf32>
    %15 = vector.shape_cast %14 : vector<128xf32> to vector<1x128xf32>
    %16 = arith.mulf %15, %7 : vector<1x128xf32>
    %cst_10 = arith.constant dense<0.000000e+00> : vector<1x128xf32>
    %17 = tpu.matmul %8, %1, %cst_10 {dimension_numbers = #tpu.dot_dimension_numbers<[1], [1], [0], [0], [0, 0, 1, 0], [], []>} : vector<1x128xf32>, vector<128x128xf32>, vector<1x128xf32> -> vector<1x128xf32>
    %18 = arith.mulf %7, %17 : vector<1x128xf32>
    %19 = arith.addf %8, %18 : vector<1x128xf32>
    %20 = arith.mulf %16, %8 : vector<1x128xf32>
    %21 = arith.subf %19, %20 : vector<1x128xf32>
    %cst_11 = arith.constant dense<0.000000e+00> : vector<1x128xf32>
    %22 = tpu.matmul %21, %1, %cst_11 {dimension_numbers = #tpu.dot_dimension_numbers<[1], [1], [0], [0], [0, 0, 1, 0], [], []>} : vector<1x128xf32>, vector<128x128xf32>, vector<1x128xf32> -> vector<1x128xf32>
    %23 = arith.mulf %7, %22 : vector<1x128xf32>
    %24 = arith.addf %8, %23 : vector<1x128xf32>
    %25 = arith.mulf %16, %21 : vector<1x128xf32>
    %26 = arith.subf %24, %25 : vector<1x128xf32>
    %cst_12 = arith.constant dense<0.000000e+00> : vector<1x128xf32>
    %27 = tpu.matmul %26, %1, %cst_12 {dimension_numbers = #tpu.dot_dimension_numbers<[1], [1], [0], [0], [0, 0, 1, 0], [], []>} : vector<1x128xf32>, vector<128x128xf32>, vector<1x128xf32> -> vector<1x128xf32>
    %28 = arith.mulf %7, %27 : vector<1x128xf32>
    %29 = arith.addf %8, %28 : vector<1x128xf32>
    %30 = arith.mulf %16, %26 : vector<1x128xf32>
    %31 = arith.subf %29, %30 : vector<1x128xf32>
    %cst_13 = arith.constant dense<0.000000e+00> : vector<1x128xf32>
    %32 = tpu.matmul %31, %1, %cst_13 {dimension_numbers = #tpu.dot_dimension_numbers<[1], [1], [0], [0], [0, 0, 1, 0], [], []>} : vector<1x128xf32>, vector<128x128xf32>, vector<1x128xf32> -> vector<1x128xf32>
    %33 = arith.mulf %7, %32 : vector<1x128xf32>
    %34 = arith.addf %8, %33 : vector<1x128xf32>
    %35 = arith.mulf %16, %31 : vector<1x128xf32>
    %36 = arith.subf %34, %35 : vector<1x128xf32>
    %cst_14 = arith.constant dense<0.000000e+00> : vector<1x128xf32>
    %37 = tpu.matmul %36, %1, %cst_14 {dimension_numbers = #tpu.dot_dimension_numbers<[1], [1], [0], [0], [0, 0, 1, 0], [], []>} : vector<1x128xf32>, vector<128x128xf32>, vector<1x128xf32> -> vector<1x128xf32>
    %38 = arith.mulf %7, %37 : vector<1x128xf32>
    %39 = arith.addf %8, %38 : vector<1x128xf32>
    %40 = arith.mulf %16, %36 : vector<1x128xf32>
    %41 = arith.subf %39, %40 : vector<1x128xf32>
    %cst_15 = arith.constant dense<0.000000e+00> : vector<1x128xf32>
    %42 = tpu.matmul %41, %1, %cst_15 {dimension_numbers = #tpu.dot_dimension_numbers<[1], [1], [0], [0], [0, 0, 1, 0], [], []>} : vector<1x128xf32>, vector<128x128xf32>, vector<1x128xf32> -> vector<1x128xf32>
    %43 = arith.mulf %7, %42 : vector<1x128xf32>
    %44 = arith.addf %8, %43 : vector<1x128xf32>
    %45 = arith.mulf %16, %41 : vector<1x128xf32>
    %46 = arith.subf %44, %45 : vector<1x128xf32>
    %cst_16 = arith.constant dense<0.000000e+00> : vector<1x128xf32>
    %47 = tpu.matmul %46, %1, %cst_16 {dimension_numbers = #tpu.dot_dimension_numbers<[1], [1], [0], [0], [0, 0, 1, 0], [], []>} : vector<1x128xf32>, vector<128x128xf32>, vector<1x128xf32> -> vector<1x128xf32>
    %48 = arith.mulf %7, %47 : vector<1x128xf32>
    %49 = arith.addf %8, %48 : vector<1x128xf32>
    %50 = arith.mulf %16, %46 : vector<1x128xf32>
    %51 = arith.subf %49, %50 : vector<1x128xf32>
    %52 = tpu.concatenate %8, %21, %26, %31, %36, %41, %46, %51 in 0 : vector<1x128xf32>, vector<1x128xf32>, vector<1x128xf32>, vector<1x128xf32>, vector<1x128xf32>, vector<1x128xf32>, vector<1x128xf32>, vector<1x128xf32> -> vector<8x128xf32>
    %53 = math.absf %52 : vector<8x128xf32>
    %cst_17 = arith.constant dense<0xFF800000> : vector<8xf32>
    %54 = vector.multi_reduction <maximumf>, %53, %cst_17 [1] : vector<8x128xf32> to vector<8xf32>
    %55 = vector.shape_cast %54 : vector<8xf32> to vector<8x1xf32>
    %cst_18 = arith.constant 9.99999996E-13 : f32
    %56 = vector.broadcast %cst_18 : f32 to vector<8x1xf32>
    %57 = arith.maximumf %55, %56 : vector<8x1xf32>
    %58 = vector.broadcast %57 : vector<8x1xf32> to vector<8x128xf32>
    %59 = arith.divf %52, %58 : vector<8x128xf32>
    %c0_19 = arith.constant 0 : index
    %c0_20 = arith.constant 0 : index
    %c0_21 = arith.constant 0 : index
    %60 = vector.load %arg4[%c0_19, %c0_20, %c0_21] : memref<1x8x128xf32, #tpu.memory_space<vmem>>, vector<1x8x128xf32>
    %61 = vector.shape_cast %60 : vector<1x8x128xf32> to vector<8x128xf32>
    %62 = vector.shape_cast %59 : vector<8x128xf32> to vector<1x8x128xf32>
    tpu.vector_store %arg4[%c0_19, %c0_20, %c0_21], %62 {strides = array<i32>} : memref<1x8x128xf32, #tpu.memory_space<vmem>>, vector<1x8x128xf32>,
    return
  }
  func.func @transform_0(%arg0: i32) -> (i32, i32, i32) {
    %c0_i32 = arith.constant 0 : i32
    %c0_i32_0 = arith.constant 0 : i32
    %c0_i32_1 = arith.constant 0 : i32
    return %arg0, %c0_i32, %c0_i32_0 : i32, i32, i32
  }
  func.func @transform_1(%arg0: i32) -> (i32, i32, i32) {
    %c0_i32 = arith.constant 0 : i32
    %c0_i32_0 = arith.constant 0 : i32
    %c0_i32_1 = arith.constant 0 : i32
    return %arg0, %c0_i32, %c0_i32_0 : i32, i32, i32
  }
  func.func @transform_2(%arg0: i32) -> (i32, i32, i32) {
    %c0_i32 = arith.constant 0 : i32
    %c0_i32_0 = arith.constant 0 : i32
    %c0_i32_1 = arith.constant 0 : i32
    return %arg0, %c0_i32, %c0_i32_0 : i32, i32, i32
  }
  func.func @transform_3(%arg0: i32) -> (i32, i32, i32) {
    %c0_i32 = arith.constant 0 : i32
    %c0_i32_0 = arith.constant 0 : i32
    %c0_i32_1 = arith.constant 0 : i32
    return %arg0, %c0_i32, %c0_i32_0 : i32, i32, i32
  }
}

</mosaic_0001>

<bundles_post_ra>
// kernel: jacobi_preprocessor.1
= control target key start
LH: loop header
LB: loop body
LE: loop exit
PB: predicated region body
PF: predicated region fallthrough
CT: control target
= control target key end

     0   :  { %8 = vsyncpa [#allocation3], 0  ;;  %s2125_s0 = inlined_call_operand.hbm [shape: f32[4,128,128], index: 0, kind: input, shape index: {}]   ;;  %s2126_s1 = inlined_call_operand.vmem [shape: f32[4,1,128], index: 1, kind: input, shape index: {}]   ;;  %s2127_s2 = inlined_call_operand.vmem [shape: f32[4,1,128], index: 2, kind: input, shape index: {}]   ;;  %s2128_s3 = inlined_call_operand.hbm [shape: f32[4,8,128], index: 3, kind: output, shape index: {}]  }
   0x1   :  { %10 = vsyncpa [#allocation3 + $0x1], 0 }
   0x2   :  { %11 = vsyncpa [#allocation4], 0 }
   0x3   :  { %13 = vsyncpa [#allocation4 + $0x1], 0  ;;  %s1720_s12 = smov 0   ;;  %s1722_s13 = smov 0  }
   0x4   :  { %s1724_s14 = smov 0   ;;  %s1726_s15 = smov 0  }
   0x5 LB: > { %s1741_s16 = sadd.s32 4294967295, %s1691_s15   ;;  %s994_s17 = sadd.s32 4294967294, %s1691_s15   ;;  %s1691_s15 = sphi %s1726_s15, %s2140_s15   ;;  %s1687_s14 = sphi %s1724_s14, %s2139_s14   ;;  %s1683_s13 = sphi %s1722_s13, %s2138_s13   ;;  %s1679_s12 = sphi %s1720_s12, %s2137_s12  }
   0x6   : > { %s1745_s18 = sadd.s32 1, %s1691_s15   ;;  %s26_s19 = sadd.s32 1, %s1687_s14 }
   0x7   : > { %s23_s20 = ssub.s32 %s1691_s15, %s1745_s18  ;;  %p33_p0 = scmp.ne.s32.totalorder %s1687_s14, %s1683_s13 }
   0x8   : > { %p24_p1 = scmp.eq.s32.totalorder %s23_s20, 0  ;;  %p34_p2 = scmp.eq.s32.totalorder %s1691_s15, 0 }
   0x9   : > { %p39_p3 = scmp.ne.s32.totalorder %s1683_s13, %s1679_s12  ;;  %p40_p4 = scmp.eq.s32.totalorder %s1741_s16, 0 }
   0xa   : > { %s1757_s21 = scalar_select %p24_p1, %s1687_s14, %s26_s19  }
   0xb   : > { %p1759_p5 = por %p34_p2, %p33_p0  ;;  %p1763_p6 = por %p40_p4, %p39_p3 }
   0xc   : > { %p115_p7 = scmp.eq.s32.totalorder %s1741_s16, 3  ;;  %p121_p8 = scmp.eq.s32.totalorder %s994_s17, 3 }
   0xd   : > { %p1552_p9 = scmp.lt.s32.totalorder %s1691_s15, 4  ;;  %s141_s26 = sand.u32 1, %s1687_s14  }
   0xe   : > { %p1769_p10 = por %p115_p7, %p33_p0  ;;  %p1773_p11 = por %p121_p8, %p39_p3 }
   0xf   : > { %s1007_s27 = sshll.u32 %s1691_s15, 11  ;;  %s997_s28 = sshll.u32 %s141_s26, 7 }
  0x10   : > { %s2132_s24 = scalar_select %p1769_p10, 1, 0 }
  0x11   : > { %s2133_s25 = scalar_select %p1773_p11, 1, 0 }
  0x12   : > { %s1782_s4 = scalar_lea.hbm %s2125_s0, %s1007_s27  ;;  %s145_s5 = scalar_lea.vmem [#allocation2], %s997_s28 }
  0x13   : > { %s152_s6 = sshll.u32 %s145_s5, 4  ;;  %p1786_p12 = pnand %p1552_p9, %p1759_p5  ;;  %s1790_s6 = int_to_ptr.vmem [resolvable:$true] %s152_s6 }
  0x14   : > { %s1792_s8 = scalar_lea.sflag [#allocation3], %s141_s26  ;;  %s1595_s9 = scalar_lea.hbm %s1782_s4, 2048 }
  0x15   : > { %p1596_p13 = scmp.ne.s32.totalorder %s1782_s4, %s1595_s9  ;;  %p1597_p0 = pneg %p1786_p12 }
  0x16   : > { %s1600_s17 = scalar_lea.hbm %s2125_s0, 8192  ;;  %p1601_p3 = scmp.lt.u32.totalorder %s1782_s4, %s2125_s0 }
  0x17   : > { %p1598_p1 = pnand %p1597_p0, %p1596_p13  ;;  %p1602_p4 = scmp.lt.u32.totalorder %s1600_s17, %s1595_s9 }
  0x18   : > { %p1604_p7 = scmp.lt.u32.totalorder %s1595_s9, %s1782_s4 }
  0x19   : > { %p1599_p2 = pneg %p1598_p1  ;;  %p1603_p5 = por %p1602_p4, %p1601_p3 }
  0x1b   : > { %p1605_p8 = por %p1604_p7, %p1603_p5 }
  0x1d   : > { %p1606_p9 = pnand %p1605_p8, %p1599_p2 }
  0x1f   : > { %1609 = shalt.err (!%p1606_p9)
}
  0x20   : > { %s1610_s22 = scalar_lea.vmem %s1790_s6, 2048  ;;  %s1693_s26 = smov [#allocation2]  }
  0x21   : > { %p1611_p13 = scmp.ne.s32.totalorder %s1790_s6, %s1610_s22  ;;  %s1615_s27 = sshll.u32 %s1693_s26, 4  ;;  %s1616_s27 = int_to_ptr.vmem [resolvable:$false] %s1615_s27 }
  0x22   : > { %s1617_s28 = scalar_lea.vmem %s1616_s27, 4096  ;;  %p1618_p10 = scmp.lt.s32.totalorder %s1790_s6, %s1616_s27 }
  0x23   : > { %p1613_p1 = pnand %p1611_p13, %p1597_p0  ;;  %p1619_p3 = scmp.lt.s32.totalorder %s1617_s28, %s1610_s22 }
  0x25   : > { %p1614_p11 = pneg %p1613_p1  ;;  %p1620_p4 = por %p1619_p3, %p1618_p10 }
  0x27   : > { %p1621_p5 = pnand %p1620_p4, %p1614_p11 }
  0x29   : > { %1624 = shalt.err (!%p1621_p5)
}
  0x2a   : > { %s1694_s29 = smov 128   ;;  %s1695_s30 = smov 8  }
  0x2b   : > { %1547 = dma.hbm_to_vmem [thread:$0]  (!%p1786_p12), %s1782_s4, 2048, %s1790_s6, %s1792_s8, %s1694_s29, %s1694_s29, %s1695_s30  }
  0x2c   : > { %p1000_p0 = scmp.ge.s32.totalorder %s1691_s15, 1  ;;  %p172_p2 = scmp.lt.s32.totalorder %s1691_s15, 5 }
  0x2e   : > { %p173_p7 = pnand %p1000_p0, %p172_p2 }
  0x2f   : > { %s1823_s5 = sand.u32 (!%p173_p7), 1, %s1683_s13  }
  0x30   : > { %176 = sbr.rel (%p173_p7) target bundleno = 1824 (0x720), region = 32  ;;  %s1001_s9 = sshll.u32 (!%p173_p7), %s1823_s5, 7 }
  0x31   : > { %s179_s10 = scalar_lea.sflag (!%p173_p7), [#allocation3], %s1823_s5  ;;  %s1827_s11 = scalar_lea.vmem (!%p173_p7), [#allocation2], %s1001_s9 }
  0x37   : > { %1670 = dma.done.wait (%p1763_p6), %s179_s10, 2048  }
  0x38   : > { %1672 = vsyncadd (%p1763_p6), %s179_s10, 4294965248  ;;  %v238_v0 = vlaneseq  ;;  %v1696_v1 = vmov 0.0|0.0   ;;  %vm1697_vm0 = vmmov 0   ;;  %v1698_v2 = vmov 0.0   ;;  %v217_v9 = vld [vmem:[%s1827_s11] sm:$0xff]  ;;  %v218_v10 = vld [vmem:[%s1827_s11 + $0x8] sm:$0xff] }
  0x39   : > { %1372 = vmatprep.subr.bf16.mxu0 %v1696_v1  ;;  %1159 = vmatprep.mubr.msk.f32.mxu0 %vm1697_vm0, %v1698_v2  ;;  %v219_v11 = vld [vmem:[%s1827_s11 + $0x10] sm:$0xff]  ;;  %v1856_v15 = vpack.c.bf16 %v218_v10, %v217_v9  ;;  %v220_v18 = vld [vmem:[%s1827_s11 + $0x18] sm:$0xff]  ;;  %v221_v22 = vld [vmem:[%s1827_s11 + $0x20] sm:$0xff]  ;;  %p211_p6 = scmp.lt.s32.totalorder %s1741_s16, 3  ;;  %s1002_s20 = sshll.u32 %s1823_s5, 3 }
  0x3a   : > { %v1836_v3 = vshrl.u32 %v238_v0, 7  ;;  %v1838_v4 = vand.u32 127, %v238_v0  ;;  %1396 = vmatprep.subr.bf16.mxu1 %v1696_v1  ;;  %1194 = vmatprep.mubr.msk.f32.mxu1 %vm1697_vm0, %v1698_v2  ;;  %v222_v26 = vld [vmem:[%s1827_s11 + $0x28] sm:$0xff]  ;;  %v1871_v28 = vpack.c.bf16 %v220_v18, %v219_v11  ;;  %v223_v31 = vld [vmem:[%s1827_s11 + $0x30] sm:$0xff]  ;;  %v224_v35 = vld [vmem:[%s1827_s11 + $0x38] sm:$0xff]  ;;  %s1004_s22 = sshll.u32 %s1741_s16, 7 }
  0x3b   : > { %1374 = vmatpush3.bf16.xpose.msra.mxu0 %v1856_v15  ;;  %1398 = vmatpush3.bf16.xpose.msra.mxu1 %v1856_v15  ;;  %v225_v39 = vld [vmem:[%s1827_s11 + $0x40] sm:$0xff]  ;;  %v226_v43 = vld [vmem:[%s1827_s11 + $0x48] sm:$0xff]  ;;  %v1889_v45 = vpack.c.bf16 %v222_v26, %v221_v22  ;;  %v227_v48 = vld [vmem:[%s1827_s11 + $0x50] sm:$0xff]  ;;  %v1906_v61 = vpack.c.bf16 %v224_v35, %v223_v31  ;;  %s212_s23 = scalar_select %p211_p6, %s1741_s16, 3 }
  0x3c   : > { %v240_v5 = vadd.s32 8, %v1836_v3  ;;  %v241_v6 = vadd.s32 16, %v1836_v3  ;;  %v242_v7 = vadd.s32 24, %v1836_v3  ;;  %vm257_vm1 = vcmp.eq.s32.totalorder %v1836_v3, %v1838_v4  ;;  %1375 = vmatprep.subr.bf16.mxu0 %v1696_v1  ;;  %1399 = vmatprep.subr.bf16.mxu1 %v1696_v1  ;;  %v228_v52 = vld [vmem:[%s1827_s11 + $0x58] sm:$0xff]  ;;  %v229_v56 = vld [vmem:[%s1827_s11 + $0x60] sm:$0xff]  ;;  %v230_v60 = vld [vmem:[%s1827_s11 + $0x68] sm:$0xff]  ;;  %s2082_s30 = scalar_lea.hbm %s2128_s3, %s1004_s22 }
  0x3d   : > { %v243_v8 = vadd.s32 32, %v1836_v3  ;;  %v244_v12 = vadd.s32 40, %v1836_v3  ;;  %v273_v13 = vsel %vm257_vm1, %v217_v9, 0.0  ;;  %v245_v19 = vadd.s32 48, %v1836_v3  ;;  %v231_v0 = vld [vmem:[%s1827_s11 + $0x70] sm:$0xff]  ;;  %s216_s7 = scalar_lea.vmem %s2127_s2, %s212_s23  ;;  %s213_s19 = scalar_lea.vmem %s2126_s1, %s212_s23 }
  0x3e   : > { %vm258_vm2 = vcmp.eq.s32.totalorder %v240_v5, %v1838_v4  ;;  %vm259_vm3 = vcmp.eq.s32.totalorder %v241_v6, %v1838_v4  ;;  %vm260_vm4 = vcmp.eq.s32.totalorder %v242_v7, %v1838_v4  ;;  %v246_v23 = vadd.s32 56, %v1836_v3  ;;  %v232_v7 = vld [vmem:[%s1827_s11 + $0x78] sm:$0xff]  ;;  %s210_s26 = scalar_lea.vmem [#allocation5], %s1002_s20  ;;  %s893_s9 = scalar_lea.sflag [#allocation4], %s1823_s5 }
  0x3f   : > { %v274_v14 = vsel %vm258_vm2, %v218_v10, 0.0  ;;  %v275_v16 = vsel %vm259_vm3, %v219_v11, 0.0  ;;  %vm261_vm5 = vcmp.eq.s32.totalorder %v243_v8, %v1838_v4  ;;  %v276_v20 = vsel %vm260_vm4, %v220_v18, 0.0  ;;  %s906_s27 = sshll.u32 %s210_s26, 4  ;;  %p2135_p11 = scmp.ne.s32.totalorder %s2132_s24, 0  ;;  %s2084_s27 = int_to_ptr.vmem [resolvable:$true] %s906_s27 }
  0x40   : > { %v289_v17 = vadd.f32 %v274_v14, %v273_v13  ;;  %vm262_vm6 = vcmp.eq.s32.totalorder %v244_v12, %v1838_v4  ;;  %v277_v24 = vsel %vm261_vm5, %v221_v22, 0.0  ;;  %vm263_vm7 = vcmp.eq.s32.totalorder %v245_v19, %v1838_v4  ;;  %v234_v12 = vld [vmem:[%s216_s7] sm:$0x1]  ;;  %s1625_s10 = scalar_lea.vmem %s2084_s27, 128  ;;  %s1699_s16 = smov [#allocation5]  }
  0x41   : > { %v247_v27 = vadd.s32 64, %v1836_v3  ;;  %v278_v29 = vsel %vm262_vm6, %v222_v26, 0.0  ;;  %vm264_vm8 = vcmp.eq.s32.totalorder %v246_v23, %v1838_v4  ;;  %v248_v32 = vadd.s32 72, %v1836_v3  ;;  %p1626_p10 = scmp.ne.s32.totalorder %s2084_s27, %s1625_s10  ;;  %s1629_s11 = sshll.u32 %s1699_s16, 4  ;;  %s1630_s11 = int_to_ptr.vmem [resolvable:$false] %s1629_s11 }
  0x42   : > { %v290_v21 = vadd.f32 %v289_v17, %v275_v16  ;;  %v279_v33 = vsel %vm263_vm7, %v223_v31, 0.0  ;;  %v249_v36 = vadd.s32 80, %v1836_v3  ;;  %v280_v37 = vsel %vm264_vm8, %v224_v35, 0.0  ;;  %v233_v17 = vld [vmem:[%s213_s19] sm:$0x1]  ;;  %s1631_s23 = scalar_lea.vmem %s1630_s11, 256  ;;  %p1632_p9 = scmp.lt.s32.totalorder %s2084_s27, %s1630_s11 }
  0x43   : > { %vm265_vm9 = vcmp.eq.s32.totalorder %v247_v27, %v1838_v4  ;;  %1377 = vmatpush3.bf16.xpose.msra.mxu0 %v1871_v28  ;;  %1401 = vmatpush3.bf16.xpose.msra.mxu1 %v1871_v28  ;;  %vm266_vm10 = vcmp.eq.s32.totalorder %v248_v32, %v1838_v4  ;;  %v250_v40 = vadd.s32 88, %v1836_v3  ;;  %v251_v44 = vadd.s32 96, %v1836_v3  ;;  %p1627_p12 = pnand %p1626_p10, %p2135_p11  ;;  %p1633_p13 = scmp.lt.s32.totalorder %s1631_s23, %s1625_s10 }
  0x44   : > { %v291_v25 = vadd.f32 %v290_v21, %v276_v20  ;;  %1378 = vmatprep.subr.bf16.mxu0 %v1696_v1  ;;  %1402 = vmatprep.subr.bf16.mxu1 %v1696_v1  ;;  %v281_v41 = vsel %vm265_vm9, %v225_v39, 0.0  ;;  %vm267_vm11 = vcmp.eq.s32.totalorder %v249_v36, %v1838_v4  ;;  %v282_v46 = vsel %vm266_vm10, %v226_v43, 0.0 }
  0x45   : > { %vm268_vm12 = vcmp.eq.s32.totalorder %v250_v40, %v1838_v4  ;;  %v252_v49 = vadd.s32 104, %v1836_v3  ;;  %v283_v50 = vsel %vm267_vm11, %v227_v48, 0.0  ;;  %vm269_vm13 = vcmp.eq.s32.totalorder %v251_v44, %v1838_v4  ;;  %p1628_p8 = pneg %p1627_p12  ;;  %p1634_p1 = por %p1633_p13, %p1632_p9 }
  0x46   : > { %v292_v30 = vadd.f32 %v291_v25, %v277_v24  ;;  %v253_v53 = vadd.s32 112, %v1836_v3  ;;  %v284_v54 = vsel %vm268_vm12, %v228_v52, 0.0  ;;  %v254_v57 = vadd.s32 120, %v1836_v3 }
  0x47   : > { %vm270_vm14 = vcmp.eq.s32.totalorder %v252_v49, %v1838_v4  ;;  %v285_v58 = vsel %vm269_vm13, %v229_v56, 0.0  ;;  %v1915_v11 = vpack.c.bf16 %v226_v43, %v225_v39  ;;  %v1932_v13 = vpack.c.bf16 %v230_v60, %v229_v56  ;;  %p1635_p3 = pnand %p1634_p1, %p1628_p8 }
  0x48   : > { %v293_v34 = vadd.f32 %v292_v30, %v278_v29  ;;  %vm271_vm15 = vcmp.eq.s32.totalorder %v253_v53, %v1838_v4  ;;  %v286_v62 = vsel %vm270_vm14, %v230_v60, 0.0  ;;  %vm272_vm1 = vcmp.eq.s32.totalorder %v254_v57, %v1838_v4 }
  0x49   : > { %v287_v5 = vsel %vm271_vm15, %v231_v0, 0.0  ;;  %v288_v8 = vsel %vm272_vm1, %v232_v7, 0.0  ;;  %v1922_v4 = vpack.c.bf16 %v228_v52, %v227_v48  ;;  %1591 = vrcp.f32 %v234_v12 }
  0x4a   : > { %v294_v38 = vadd.f32 %v293_v34, %v279_v33  ;;  %v1938_v14 = vpack.c.bf16 %v232_v7, %v231_v0  ;;  %v1997_v33 = vsub.s32 0, %v1836_v3  ;;  %vm871_vm2 = vcmask 1040384  }
  0x4b   : > { %1380 = vmatpush3.bf16.xpose.msra.mxu0 %v1889_v45  ;;  %1404 = vmatpush3.bf16.xpose.msra.mxu1 %v1889_v45  ;;  %vm873_vm3 = vcmask 1041408   ;;  %vm875_vm4 = vcmask 1042432   ;;  %vm877_vm5 = vcmask 1043456   ;;  %vm881_vm6 = vcmask 1045504  }
  0x4c   : > { %v295_v42 = vadd.f32 %v294_v38, %v280_v37  ;;  %1381 = vmatprep.subr.bf16.mxu0 %v1696_v1  ;;  %1405 = vmatprep.subr.bf16.mxu1 %v1696_v1  ;;  %vm883_vm7 = vcmask 1046528  }
  0x4e   : > { %v296_v47 = vadd.f32 %v295_v42, %v281_v41 }
  0x50   : > { %v297_v51 = vadd.f32 %v296_v47, %v282_v46 }
  0x52   : > { %v298_v55 = vadd.f32 %v297_v51, %v283_v50 }
  0x53   : > { %1383 = vmatpush3.bf16.xpose.msra.mxu0 %v1906_v61  ;;  %1407 = vmatpush3.bf16.xpose.msra.mxu1 %v1906_v61  ;;  %v1943_v16 = vpop.eup %1591 }
  0x54   : > { %v299_v59 = vadd.f32 %v298_v55, %v284_v54  ;;  %1384 = vmatprep.subr.bf16.mxu0 %v1696_v1  ;;  %1408 = vmatprep.subr.bf16.mxu1 %v1696_v1  ;;  %v1950_v18 = vmul.f32 %v1943_v16, %v233_v17 }
  0x56   : > { %v300_v63 = vadd.f32 %v299_v59, %v285_v58 }
  0x58   : > { %v301_v6 = vadd.f32 %v300_v63, %v286_v62 }
  0x5a   : > { %v302_v9 = vadd.f32 %v301_v6, %v287_v5 }
  0x5b   : > { %1386 = vmatpush3.bf16.xpose.msra.mxu0 %v1915_v11  ;;  %1410 = vmatpush3.bf16.xpose.msra.mxu1 %v1915_v11 }
  0x5c   : > { %v303_v10 = vadd.f32 %v302_v9, %v288_v8  ;;  %1387 = vmatprep.subr.bf16.mxu0 %v1696_v1  ;;  %1411 = vmatprep.subr.bf16.mxu1 %v1696_v1 }
  0x5e   : > { %v304_v19 = vrot.slane %v303_v10, 4 }
  0x60   : > { %v305_v20 = vadd.f32 %v304_v19, %v303_v10 }
  0x62   : > { %v306_v21 = vrot.slane %v305_v20, 2 }
  0x63   : > { %1389 = vmatpush3.bf16.xpose.msra.mxu0 %v1922_v4  ;;  %1413 = vmatpush3.bf16.xpose.msra.mxu1 %v1922_v4 }
  0x64   : > { %1390 = vmatprep.subr.bf16.mxu0 %v1696_v1  ;;  %1414 = vmatprep.subr.bf16.mxu1 %v1696_v1  ;;  %v307_v22 = vadd.f32 %v306_v21, %v305_v20 }
  0x66   : > { %v308_v23 = vrot.slane %v307_v22, 1 }
  0x68   : > { %v309_v24 = vadd.f32 %v308_v23, %v307_v22 }
  0x6a   : > { %v1972_v25 = vmul.f32 %v1943_v16, %v309_v24 }
  0x6b   : > { %1392 = vmatpush3.bf16.xpose.msra.mxu0 %v1932_v13  ;;  %1416 = vmatpush3.bf16.xpose.msra.mxu1 %v1932_v13 }
  0x6c   : > { %1393 = vmatprep.subr.bf16.mxu0 %v1696_v1  ;;  %1417 = vmatprep.subr.bf16.mxu1 %v1696_v1  ;;  %v383_v30 = vmul.f32 %v1972_v25, %v1950_v18 }
  0x73   : > { %1395 = vmatpush3.bf16.xpose.msra.mxu0 %v1938_v14  ;;  %1419 = vmatpush3.bf16.xpose.msra.mxu1 %v1938_v14 }
  0x74   : > { %1420 = vmatprep.subr.bf16.mxu0 %v1696_v1  ;;  %1444 = vmatprep.subr.bf16.mxu1 %v1696_v1 }
  0x7a   : > { %1160 = vmatmul.mubr.f32.vlgmr.msra.gmra.mrb[0].mxu0 %v1950_v18 }
  0x7b   : > { %1422 = vmatpush3.bf16.xpose.msra.mxu0 %v1856_v15  ;;  %1229 = vmatprep.mubr.msk.f32.mxu0 %vm1697_vm0, %v1698_v2 }
  0x7c   : > { %1423 = vmatprep.subr.bf16.mxu0 %v1696_v1 }
  0x83   : > { %1425 = vmatpush3.bf16.xpose.msra.mxu0 %v1871_v28 }
  0x84   : > { %1426 = vmatprep.subr.bf16.mxu0 %v1696_v1 }
  0x8b   : > { %1428 = vmatpush3.bf16.xpose.msra.mxu0 %v1889_v45 }
  0x8c   : > { %1429 = vmatprep.subr.bf16.mxu0 %v1696_v1 }
  0x93   : > { %1431 = vmatpush3.bf16.xpose.msra.mxu0 %v1906_v61 }
  0x94   : > { %1432 = vmatprep.subr.bf16.mxu0 %v1696_v1 }
  0x9b   : > { %1434 = vmatpush3.bf16.xpose.msra.mxu0 %v1915_v11 }
  0x9c   : > { %1435 = vmatprep.subr.bf16.mxu0 %v1696_v1 }
  0xa3   : > { %1437 = vmatpush3.bf16.xpose.msra.mxu0 %v1922_v4 }
  0xa4   : > { %1438 = vmatprep.subr.bf16.mxu0 %v1696_v1 }
  0xab   : > { %1440 = vmatpush3.bf16.xpose.msra.mxu0 %v1932_v13 }
  0xac   : > { %1441 = vmatprep.subr.bf16.mxu0 %v1696_v1 }
  0xb3   : > { %1443 = vmatpush3.bf16.xpose.msra.mxu0 %v1938_v14 }
  0xb4   : > { %1468 = vmatprep.subr.bf16.mxu0 %v1696_v1 }
 0x14d   : > { %v377_v26 = vpop.f32.mrb[0].mxu0 }
 0x14e   : > { %v381_v27 = vmul.f32 %v1943_v16, %v377_v26  ;;  %v1161_v29 = vpop.f32.mrb[1].mxu0 }
 0x150   : > { %v382_v31 = vadd.f32 %v381_v27, %v1950_v18 }
 0x152   : > { %v384_v32 = vsub.f32 %v382_v31, %v383_v30 }
 0x154   : > { %1195 = vmatmul.mubr.f32.vlgmr.msra.gmra.mrb[0].mxu1 %v384_v32  ;;  %v457_v38 = vmul.f32 %v384_v32, %v1972_v25  ;;  %v833_v39 = vrot.slane %v384_v32, %v1997_v33 }
 0x155   : > { %1446 = vmatpush3.bf16.xpose.msra.mxu1 %v1856_v15  ;;  %1264 = vmatprep.mubr.msk.f32.mxu1 %vm1697_vm0, %v1698_v2 }
 0x156   : > { %1447 = vmatprep.subr.bf16.mxu1 %v1696_v1  ;;  %v872_v42 = vsel %vm871_vm2, %v1950_v18, %v833_v39 }
 0x15d   : > { %1449 = vmatpush3.bf16.xpose.msra.mxu1 %v1871_v28 }
 0x15e   : > { %1450 = vmatprep.subr.bf16.mxu1 %v1696_v1 }
 0x165   : > { %1452 = vmatpush3.bf16.xpose.msra.mxu1 %v1889_v45 }
 0x166   : > { %1453 = vmatprep.subr.bf16.mxu1 %v1696_v1 }
 0x16d   : > { %1455 = vmatpush3.bf16.xpose.msra.mxu1 %v1906_v61 }
 0x16e   : > { %1456 = vmatprep.subr.bf16.mxu1 %v1696_v1 }
 0x175   : > { %1458 = vmatpush3.bf16.xpose.msra.mxu1 %v1915_v11 }
 0x176   : > { %1459 = vmatprep.subr.bf16.mxu1 %v1696_v1 }
 0x17d   : > { %1461 = vmatpush3.bf16.xpose.msra.mxu1 %v1922_v4 }
 0x17e   : > { %1462 = vmatprep.subr.bf16.mxu1 %v1696_v1 }
 0x185   : > { %1464 = vmatpush3.bf16.xpose.msra.mxu1 %v1932_v13 }
 0x186   : > { %1465 = vmatprep.subr.bf16.mxu1 %v1696_v1 }
 0x18d   : > { %1467 = vmatpush3.bf16.xpose.msra.mxu1 %v1938_v14 }
 0x18e   : > { %1492 = vmatprep.subr.bf16.mxu1 %v1696_v1 }
 0x227   : > { %v451_v34 = vpop.f32.mrb[0].mxu1 }
 0x228   : > { %v455_v35 = vmul.f32 %v1943_v16, %v451_v34  ;;  %v1196_v36 = vpop.f32.mrb[1].mxu1 }
 0x22a   : > { %v456_v37 = vadd.f32 %v455_v35, %v1950_v18 }
 0x22c   : > { %v458_v40 = vsub.f32 %v456_v37, %v457_v38 }
 0x22e   : > { %v839_v41 = vrot.slane %v458_v40, %v1997_v33  ;;  %1230 = vmatmul.mubr.f32.vlgmr.msra.gmra.mrb[2].mxu0 %v458_v40  ;;  %v531_v48 = vmul.f32 %v458_v40, %v1972_v25 }
 0x22f   : > { %1470 = vmatpush3.bf16.xpose.msra.mxu0 %v1856_v15  ;;  %1299 = vmatprep.mubr.msk.f32.mxu0 %vm1697_vm0, %v1698_v2 }
 0x230   : > { %1471 = vmatprep.subr.bf16.mxu0 %v1696_v1  ;;  %v874_v3 = vsel %vm873_vm3, %v872_v42, %v839_v41 }
 0x237   : > { %1473 = vmatpush3.bf16.xpose.msra.mxu0 %v1871_v28 }
 0x238   : > { %1474 = vmatprep.subr.bf16.mxu0 %v1696_v1 }
 0x23f   : > { %1476 = vmatpush3.bf16.xpose.msra.mxu0 %v1889_v45 }
 0x240   : > { %1477 = vmatprep.subr.bf16.mxu0 %v1696_v1 }
 0x247   : > { %1479 = vmatpush3.bf16.xpose.msra.mxu0 %v1906_v61 }
 0x248   : > { %1480 = vmatprep.subr.bf16.mxu0 %v1696_v1 }
 0x24f   : > { %1482 = vmatpush3.bf16.xpose.msra.mxu0 %v1915_v11 }
 0x250   : > { %1483 = vmatprep.subr.bf16.mxu0 %v1696_v1 }
 0x257   : > { %1485 = vmatpush3.bf16.xpose.msra.mxu0 %v1922_v4 }
 0x258   : > { %1486 = vmatprep.subr.bf16.mxu0 %v1696_v1 }
 0x25f   : > { %1488 = vmatpush3.bf16.xpose.msra.mxu0 %v1932_v13 }
 0x260   : > { %1489 = vmatprep.subr.bf16.mxu0 %v1696_v1 }
 0x267   : > { %1491 = vmatpush3.bf16.xpose.msra.mxu0 %v1938_v14 }
 0x268   : > { %1516 = vmatprep.subr.bf16.mxu0 %v1696_v1 }
 0x301   : > { %v525_v43 = vpop.f32.mrb[2].mxu0 }
 0x302   : > { %v529_v44 = vmul.f32 %v1943_v16, %v525_v43  ;;  %v1231_v46 = vpop.f32.mrb[3].mxu0 }
 0x304   : > { %v530_v47 = vadd.f32 %v529_v44, %v1950_v18 }
 0x306   : > { %v532_v49 = vsub.f32 %v530_v47, %v531_v48 }
 0x308   : > { %v845_v50 = vrot.slane %v532_v49, %v1997_v33  ;;  %1265 = vmatmul.mubr.f32.vlgmr.msra.gmra.mrb[2].mxu1 %v532_v49  ;;  %v605_v56 = vmul.f32 %v532_v49, %v1972_v25 }
 0x309   : > { %1494 = vmatpush3.bf16.xpose.msra.mxu1 %v1856_v15  ;;  %1334 = vmatprep.mubr.msk.f32.mxu1 %vm1697_vm0, %v1698_v2 }
 0x30a   : > { %1495 = vmatprep.subr.bf16.mxu1 %v1696_v1  ;;  %v876_v51 = vsel %vm875_vm4, %v874_v3, %v845_v50 }
 0x311   : > { %1497 = vmatpush3.bf16.xpose.msra.mxu1 %v1871_v28 }
 0x312   : > { %1498 = vmatprep.subr.bf16.mxu1 %v1696_v1 }
 0x319   : > { %1500 = vmatpush3.bf16.xpose.msra.mxu1 %v1889_v45 }
 0x31a   : > { %1501 = vmatprep.subr.bf16.mxu1 %v1696_v1 }
 0x321   : > { %1503 = vmatpush3.bf16.xpose.msra.mxu1 %v1906_v61 }
 0x322   : > { %1504 = vmatprep.subr.bf16.mxu1 %v1696_v1 }
 0x329   : > { %1506 = vmatpush3.bf16.xpose.msra.mxu1 %v1915_v11 }
 0x32a   : > { %1507 = vmatprep.subr.bf16.mxu1 %v1696_v1 }
 0x331   : > { %1509 = vmatpush3.bf16.xpose.msra.mxu1 %v1922_v4 }
 0x332   : > { %1510 = vmatprep.subr.bf16.mxu1 %v1696_v1 }
 0x339   : > { %1512 = vmatpush3.bf16.xpose.msra.mxu1 %v1932_v13 }
 0x33a   : > { %1513 = vmatprep.subr.bf16.mxu1 %v1696_v1 }
 0x341   : > { %1515 = vmatpush3.bf16.xpose.msra.mxu1 %v1938_v14 }
 0x3db   : > { %v599_v52 = vpop.f32.mrb[2].mxu1 }
 0x3dc   : > { %v603_v53 = vmul.f32 %v1943_v16, %v599_v52  ;;  %v1266_v54 = vpop.f32.mrb[3].mxu1 }
 0x3de   : > { %v604_v55 = vadd.f32 %v603_v53, %v1950_v18 }
 0x3e0   : > { %v606_v57 = vsub.f32 %v604_v55, %v605_v56 }
 0x3e2   : > { %v851_v58 = vrot.slane %v606_v57, %v1997_v33  ;;  %1300 = vmatmul.mubr.f32.vlgmr.msra.gmra.mrb[4].mxu0 %v606_v57  ;;  %v679_v60 = vmul.f32 %v606_v57, %v1972_v25 }
 0x3e3   : > { %1518 = vmatpush3.bf16.xpose.msra.mxu0 %v1856_v15  ;;  %1369 = vmatprep.mubr.msk.f32.mxu0 %vm1697_vm0, %v1698_v2  ;;  %vm879_vm0 = vcmask 1044480  }
 0x3e4   : > { %1519 = vmatprep.subr.bf16.mxu0 %v1696_v1  ;;  %v878_v59 = vsel %vm877_vm5, %v876_v51, %v851_v58 }
 0x3eb   : > { %1521 = vmatpush3.bf16.xpose.msra.mxu0 %v1871_v28 }
 0x3ec   : > { %1522 = vmatprep.subr.bf16.mxu0 %v1696_v1 }
 0x3f3   : > { %1524 = vmatpush3.bf16.xpose.msra.mxu0 %v1889_v45 }
 0x3f4   : > { %1525 = vmatprep.subr.bf16.mxu0 %v1696_v1 }
 0x3fb   : > { %1527 = vmatpush3.bf16.xpose.msra.mxu0 %v1906_v61 }
 0x3fc   : > { %1528 = vmatprep.subr.bf16.mxu0 %v1696_v1 }
 0x403   : > { %1530 = vmatpush3.bf16.xpose.msra.mxu0 %v1915_v11 }
 0x404   : > { %1531 = vmatprep.subr.bf16.mxu0 %v1696_v1 }
 0x40b   : > { %1533 = vmatpush3.bf16.xpose.msra.mxu0 %v1922_v4 }
 0x40c   : > { %1534 = vmatprep.subr.bf16.mxu0 %v1696_v1 }
 0x413   : > { %1536 = vmatpush3.bf16.xpose.msra.mxu0 %v1932_v13 }
 0x414   : > { %1537 = vmatprep.subr.bf16.mxu0 %v1696_v1 }
 0x41b   : > { %1539 = vmatpush3.bf16.xpose.msra.mxu0 %v1938_v14 }
 0x4b5   : > { %v673_v2 = vpop.f32.mrb[4].mxu0 }
 0x4b6   : > { %v677_v15 = vmul.f32 %v1943_v16, %v673_v2  ;;  %v1301_v28 = vpop.f32.mrb[5].mxu0 }
 0x4b8   : > { %v678_v45 = vadd.f32 %v677_v15, %v1950_v18 }
 0x4ba   : > { %v680_v61 = vsub.f32 %v678_v45, %v679_v60 }
 0x4bc   : > { %v857_v62 = vrot.slane %v680_v61, %v1997_v33  ;;  %1335 = vmatmul.mubr.f32.vlgmr.msra.gmra.mrb[4].mxu1 %v680_v61  ;;  %v753_v7 = vmul.f32 %v680_v61, %v1972_v25 }
 0x4be   : > { %v880_v63 = vsel %vm879_vm0, %v878_v59, %v857_v62 }
 0x58f   : > { %v747_v0 = vpop.f32.mrb[4].mxu1 }
 0x590   : > { %v751_v5 = vmul.f32 %v1943_v16, %v747_v0  ;;  %v1336_v1 = vpop.f32.mrb[5].mxu1 }
 0x592   : > { %v752_v6 = vadd.f32 %v751_v5, %v1950_v18 }
 0x594   : > { %v754_v8 = vsub.f32 %v752_v6, %v753_v7 }
 0x596   : > { %1370 = vmatmul.mubr.f32.vlgmr.msra.gmra.mrb[6].mxu0 %v754_v8  ;;  %v863_v9 = vrot.slane %v754_v8, %v1997_v33  ;;  %v827_v14 = vmul.f32 %v754_v8, %v1972_v25 }
 0x598   : > { %v882_v10 = vsel %vm881_vm6, %v880_v63, %v863_v9 }
 0x669   : > { %v821_v11 = vpop.f32.mrb[6].mxu0 }
 0x66a   : > { %v825_v4 = vmul.f32 %v1943_v16, %v821_v11  ;;  %v1371_v12 = vpop.f32.mrb[7].mxu0 }
 0x66c   : > { %v826_v13 = vadd.f32 %v825_v4, %v1950_v18 }
 0x66e   : > { %v828_v17 = vsub.f32 %v826_v13, %v827_v14 }
 0x670   : > { %v869_v19 = vrot.slane %v828_v17, %v1997_v33 }
 0x672   : > { %v884_v20 = vsel %vm883_vm7, %v882_v10, %v869_v19 }
 0x673   : > { %v885_v21 = vand.u32 2147483647, %v884_v20 }
 0x675   : > { %886 = vmax.xlane.f32.xlu0 %v885_v21 }
 0x702   : > { %v887_v22 = vpop.xlane.xlu0 %886 }
 0x703   : > { %v888_v23 = vmax.f32 %v887_v22, 1e-12 }
 0x705   : > { %1593 = vrcp.f32 %v888_v23 }
 0x70f   : > { %v1594_v16 = vpop.eup %1593 }
 0x710   : > { %v890_v18 = vmul.f32 %v1594_v16, %v884_v20 }
 0x712   : > { %891 = vst [vmem:[%s210_s26] sm:$0xff] %v890_v18 }
 0x713   : > { %1638 = shalt.err (!%p1635_p3)
}
 0x714   : > { %s1639_s5 = scalar_lea.hbm %s2082_s30, 128  ;;  %s1643_s7 = scalar_lea.hbm %s2128_s3, 512 }
 0x715   : > { %p1640_p4 = scmp.ne.s32.totalorder %s2082_s30, %s1639_s5  ;;  %p1644_p2 = scmp.lt.u32.totalorder %s2082_s30, %s2128_s3 }
 0x716   : > { %p1645_p7 = scmp.lt.u32.totalorder %s1643_s7, %s1639_s5  ;;  %p1647_p10 = scmp.lt.u32.totalorder %s1639_s5, %s2082_s30 }
 0x717   : > { %p1641_p5 = pnand %p1640_p4, %p2135_p11 }
 0x718   : > { %p1646_p6 = por %p1645_p7, %p1644_p2 }
 0x719   : > { %p1642_p0 = pneg %p1641_p5 }
 0x71a   : > { %p1648_p12 = por %p1647_p10, %p1646_p6 }
 0x71c   : > { %p1649_p8 = pnand %p1648_p12, %p1642_p0 }
 0x71e   : > { %1652 = shalt.err (!%p1649_p8)
}
 0x71f   : > { %1542 = dma.vmem_to_hbm [thread:$0]  (%p2135_p11), %s2084_s27, 128, %s2082_s30, %s893_s9  }
 0x720 PF: > { %p1553_p9 = scmp.ge.s32.totalorder %s1691_s15, 2  ;;  %s918_s19 = sand.u32 1, %s1679_s12  }
 0x721   : > { %p2136_p13 = scmp.ne.s32.totalorder %s2133_s25, 0  ;;  %s919_s20 = scalar_lea.sflag [#allocation4], %s918_s19 }
 0x723   : > { %p1549_p1 = pnand %p1553_p9, %p2136_p13 }
 0x725   : > { %1674 = dma.done.wait (!%p1549_p1), %s919_s20, 128  }
 0x726   : > { %1676 = vsyncadd (!%p1549_p1), %s919_s20, 4294967168  ;;  %p16_p3 = scmp.ge.s32.totalorder %s1745_s18, 6   ;;  %s2137_s12 = smov %s1683_s13 }
 0x727   : > { %s2138_s13 = smov %s1687_s14  ;;  %s2139_s14 = smov %s1757_s21 }
 0x728   : > { %s2140_s15 = smov %s1745_s18  ;;  %18 = sbr.rel (!%p16_p3) target bundleno = 5 (0x5), region = 83 }
 0x72f   :  { %924 = vsyncpa [#allocation3], 1 }
 0x730   :  { %926 = vsyncpa [#allocation3 + $0x1], 1 }
 0x731   :  { %927 = vsyncpa [#allocation4], 1 }
 0x732   :  { %929 = vsyncpa [#allocation4 + $0x1], 1 }

</bundles_post_ra>
